<compile_context>
chip_gen: v7x
topology: tpu7x:2x2x1
jax: 0.10.0
libtpu: 0.0.40
codegen_flags: <defaults>
</compile_context>

<pallas_src>
import functools

import jax
import jax.numpy as jnp
from jax.experimental import pallas as pl
from jax.experimental.pallas import tpu as pltpu


def _label_smooth_kernel(x_ref, t_ref, loss_ref, *, smoothing):
    # x_ref: (TB, C) logits tile, t_ref: (TB, 1) int32 targets, loss_ref: (TB, 1) f32.
    x = x_ref[...].astype(jnp.float32)                     # f32 working copy (bf16-safe)
    c = x.shape[-1]
    off_val = smoothing / (c - 1.0)                        # static python float

    # Max-shifted logsumexp: XLU row-reduces + EUP exp/log (separate VLIW slots from VPU).
    m = jnp.max(x, axis=-1, keepdims=True)                 # (TB, 1)
    shifted = x - m
    lse = jnp.log(jnp.sum(jnp.exp(shifted), axis=-1, keepdims=True))  # (TB, 1)

    # Fused weighted reduction (sum_c w_c == 1):
    #   loss = -sum_c w_c * (shifted_c - lse)
    #        = lse - [off * sum_c shifted_c + (1 - smoothing - off) * shifted[target]]
    row_sum = jnp.sum(shifted, axis=-1, keepdims=True)     # (TB, 1)
    cls_idx = jax.lax.broadcasted_iota(jnp.int32, shifted.shape, dimension=1)
    tgt = t_ref[...]                                       # (TB, 1), broadcasts across lanes
    shifted_at_tgt = jnp.sum(
        jnp.where(cls_idx == tgt, shifted, 0.0), axis=-1, keepdims=True)

    loss_ref[...] = lse - off_val * row_sum - (1.0 - smoothing - off_val) * shifted_at_tgt


def _vmem_budget_bytes():
    # Use ~half the physical VMEM of the current generation (leaves headroom for Pallas
    # internals); fall back to a conservative 32 MiB if the query is unavailable.
    try:
        cap = int(pltpu.get_tpu_info().vmem_capacity_bytes)
    except Exception:
        cap = 64 * 1024 * 1024
    return cap // 2


def _pick_tile_rows(b, c, in_itemsize, budget_bytes):
    # Account for 2 pipeline buffers of the input tile + ~2 f32 working copies in-kernel.
    bytes_per_row = c * (2 * in_itemsize + 2 * 4) + 64
    tb = 1024                       # >=512 rows ~ HBM roofline; 1024 amortizes step overhead
    while tb > 8 and tb * bytes_per_row > budget_bytes:
        tb //= 2
    b_pad8 = ((b + 7) // 8) * 8     # never tile wider than the (sublane-padded) batch
    tb = min(tb, b_pad8)
    return max(8, (tb // 8) * 8)


def label_smooth_loss(logits, target, smoothing=0.0):
    """logits: (B, C) float (f32 or bf16), target: (B,) int -> per-sample loss (B,) f32."""
    b, c = logits.shape
    if c < 2:
        raise ValueError("LabelSmoothLoss needs at least 2 classes (weight uses C - 1).")

    budget = _vmem_budget_bytes()
    tb = _pick_tile_rows(b, c, jnp.dtype(logits.dtype).itemsize, budget)
    b_pad = ((b + tb - 1) // tb) * tb
    grid = (b_pad // tb,)

    x = logits                                   # keep caller dtype (bf16 stays bf16 in HBM)
    t2d = target.astype(jnp.int32).reshape(b, 1)
    if b_pad != b:
        x = jnp.pad(x, ((0, b_pad - b), (0, 0)))
        t2d = jnp.pad(t2d, ((0, b_pad - b), (0, 0)))

    kernel = functools.partial(_label_smooth_kernel, smoothing=float(smoothing))
    loss2d = pl.pallas_call(
        kernel,
        out_shape=jax.ShapeDtypeStruct((b_pad, 1), jnp.float32),
        grid=grid,
        in_specs=[
            pl.BlockSpec((tb, c), lambda i: (i, 0)),   # logits tile, auto double-buffered
            pl.BlockSpec((tb, 1), lambda i: (i, 0)),   # target tile
        ],
        out_specs=pl.BlockSpec((tb, 1), lambda i: (i, 0)),
        compiler_params=pltpu.CompilerParams(
            dimension_semantics=("parallel",),          # batch tiles shard across TCs on v7x
            vmem_limit_bytes=int(budget),
        ),
    )(x, t2d)
    return loss2d.reshape(b_pad)[:b]


def _reference(logits, target, smoothing=0.0):
    # Pure-JAX reference mirroring the PyTorch forward exactly.
    logits = logits.astype(jnp.float32)
    c = logits.shape[-1]
    log_prob = jax.nn.log_softmax(logits, axis=-1)
    weight = jnp.full_like(logits, smoothing / (c - 1.0))
    one_hot = jax.nn.one_hot(target, c, dtype=logits.dtype)
    weight = weight * (1.0 - one_hot) + one_hot * (1.0 - smoothing)
    return (-weight * log_prob).sum(axis=-1)


def _check(key, b, c, dtype, smoothing):
    k1, k2 = jax.random.split(key)
    logits = jax.random.normal(k1, (b, c), dtype=jnp.float32).astype(dtype)
    target = jax.random.randint(k2, (b,), 0, c, dtype=jnp.int32)
    loss = jax.block_until_ready(label_smooth_loss(logits, target, smoothing=smoothing))
    ref = _reference(logits, target, smoothing=smoothing)
    assert loss.shape == (b,)
    assert jnp.allclose(loss, ref, atol=1e-5, rtol=1e-5), (loss, ref)


if __name__ == "__main__":
    key = jax.random.PRNGKey(0)
    keys = jax.random.split(key, 3)

    # Small MNIST-like shape (10 classes), matching the PyTorch module's typical use.
    _check(keys[0], b=8, c=10, dtype=jnp.float32, smoothing=0.1)
    # Multi-tile grid + batch-padding path (B not a multiple of the chosen tile).
    _check(keys[1], b=2500, c=10, dtype=jnp.float32, smoothing=0.1)
    # bf16 logits pass through unconverted; the f32 upcast happens inside the kernel.
    _check(keys[2], b=64, c=10, dtype=jnp.bfloat16, smoothing=0.2)

    print("KERNEL_OK")
</pallas_src>

<mosaic_0001>
module attributes {stable_mosaic.version = 11 : i64} {
  func.func @_label_smooth_kernel(%arg0: i32, %arg1: memref<8x10xf32, #tpu.memory_space<vmem>>, %arg2: memref<8x1xi32, #tpu.memory_space<vmem>>, %arg3: memref<8x1xf32, #tpu.memory_space<vmem>>) attributes {dimension_semantics = [#tpu.dimension_semantics<parallel>], iteration_bounds = array<i64: 1>, scalar_prefetch = 0 : i64, scratch_operands = 0 : i64, tpu.core_type = #tpu.core_type<tc>, window_params = [{transform_indices = @transform_0, window_bounds = array<i64: 8, 10>}, {transform_indices = @transform_1, window_bounds = array<i64: 8, 1>}, {transform_indices = @transform_2, window_bounds = array<i64: 8, 1>}]} {
    %c0 = arith.constant 0 : index
    %c0_0 = arith.constant 0 : index
    %0 = vector.load %arg1[%c0, %c0_0] : memref<8x10xf32, #tpu.memory_space<vmem>>, vector<8x10xf32>
    %cst = arith.constant dense<0xFF800000> : vector<8xf32>
    %1 = vector.multi_reduction <maximumf>, %0, %cst [1] : vector<8x10xf32> to vector<8xf32>
    %2 = vector.shape_cast %1 : vector<8xf32> to vector<8x1xf32>
    %3 = vector.broadcast %2 : vector<8x1xf32> to vector<8x10xf32>
    %4 = arith.subf %0, %3 : vector<8x10xf32>
    %5 = math.exp %4 : vector<8x10xf32>
    %cst_1 = arith.constant dense<0.000000e+00> : vector<8xf32>
    %6 = vector.multi_reduction <add>, %5, %cst_1 [1] : vector<8x10xf32> to vector<8xf32>
    %7 = vector.shape_cast %6 : vector<8xf32> to vector<8x1xf32>
    %8 = math.log %7 : vector<8x1xf32>
    %cst_2 = arith.constant dense<0.000000e+00> : vector<8xf32>
    %9 = vector.multi_reduction <add>, %4, %cst_2 [1] : vector<8x10xf32> to vector<8xf32>
    %10 = vector.shape_cast %9 : vector<8xf32> to vector<8x1xf32>
    %11 = tpu.iota {dimensions = array<i32: 1>} : vector<8x10xi32>
    %c0_3 = arith.constant 0 : index
    %c0_4 = arith.constant 0 : index
    %12 = vector.load %arg2[%c0_3, %c0_4] : memref<8x1xi32, #tpu.memory_space<vmem>>, vector<8x1xi32>
    %13 = vector.broadcast %12 : vector<8x1xi32> to vector<8x10xi32>
    %14 = arith.cmpi eq, %11, %13 : vector<8x10xi32>
    %cst_5 = arith.constant 0.000000e+00 : f32
    %15 = vector.broadcast %cst_5 : f32 to vector<8x10xf32>
    %16 = arith.select %14, %4, %15 : vector<8x10xi1>, vector<8x10xf32>
    %cst_6 = arith.constant dense<0.000000e+00> : vector<8xf32>
    %17 = vector.multi_reduction <add>, %16, %cst_6 [1] : vector<8x10xf32> to vector<8xf32>
    %18 = vector.shape_cast %17 : vector<8xf32> to vector<8x1xf32>
    %cst_7 = arith.constant 0.0111111114 : f32
    %19 = vector.broadcast %cst_7 : f32 to vector<8x1xf32>
    %20 = arith.mulf %19, %10 : vector<8x1xf32>
    %21 = arith.subf %8, %20 : vector<8x1xf32>
    %cst_8 = arith.constant 0.888888895 : f32
    %22 = vector.broadcast %cst_8 : f32 to vector<8x1xf32>
    %23 = arith.mulf %22, %18 : vector<8x1xf32>
    %24 = arith.subf %21, %23 : vector<8x1xf32>
    %c0_9 = arith.constant 0 : index
    %c0_10 = arith.constant 0 : index
    %25 = vector.load %arg3[%c0_9, %c0_10] : memref<8x1xf32, #tpu.memory_space<vmem>>, vector<8x1xf32>
    tpu.vector_store %arg3[%c0_9, %c0_10], %24 {strides = array<i32>} : memref<8x1xf32, #tpu.memory_space<vmem>>, vector<8x1xf32>,
    return
  }
  func.func @transform_0(%arg0: i32) -> (i32, i32) {
    %c0_i32 = arith.constant 0 : i32
    %c0_i32_0 = arith.constant 0 : i32
    return %arg0, %c0_i32 : i32, i32
  }
  func.func @transform_1(%arg0: i32) -> (i32, i32) {
    %c0_i32 = arith.constant 0 : i32
    %c0_i32_0 = arith.constant 0 : i32
    return %arg0, %c0_i32 : i32, i32
  }
  func.func @transform_2(%arg0: i32) -> (i32, i32) {
    %c0_i32 = arith.constant 0 : i32
    %c0_i32_0 = arith.constant 0 : i32
    return %arg0, %c0_i32 : i32, i32
  }
}

</mosaic_0001>

<bundles_post_ra>
// kernel: tpu_custom_call.1
= control target key start
LH: loop header
LB: loop body
LE: loop exit
PB: predicated region body
PF: predicated region fallthrough
CT: control target
= control target key end

     0   :  { %vm12_vm0 = vcmask 80896   ;;  %v54_v1 = vmov 0   ;;  %v27_v7 = vlaneseq  ;;  %vm42_vm2 = vcmask 7168   ;;  %s83_s0 = inlined_call_operand.vmem [shape: f32[8,10], index: 0, kind: input, shape index: {}]   ;;  %s84_s1 = inlined_call_operand.vmem [shape: s32[8,1], index: 1, kind: input, shape index: {}]   ;;  %s85_s2 = inlined_call_operand.vmem [shape: f32[8,1], index: 2, kind: output, shape index: {}]  }
   0x1   :  { %v11_v0 = vld [vmem:[%s83_s0] sm:$0xff]  ;;  %49 = vset.pattern.permute.xlu0 %v54_v1 }
   0x2   :  { %v13_v2 = vsel %vm12_vm0, %v11_v0, -inf  ;;  %v29_v3 = vld [vmem:[%s84_s1] sm:$0xff]  ;;  %v28_v8 = vand.u32 127, %v27_v7 }
   0x3   :  { %14 = vmax.xlane.f32.xlu0 %v13_v2 }
  0x19   :  { %31 = vperm.xlu0 %49, %v29_v3  }
  0x90   :  { %v15_v4 = vpop.xlane.xlu0 %14 }
  0x91   :  { %v16_v5 = vsub.f32 %v11_v0, %v15_v4 }
  0x93   :  { %v17_v6 = vmul.f32 1.442695, %v16_v5  ;;  %v24_v12 = vsel %vm12_vm0, %v16_v5, 0.0 }
  0x95   :  { %50 = vpow2.f32 %v17_v6 }
  0x98   :  { %v32_v10 = vpop.permute.xlu0 %31 }
  0x99   :  { %vm33_vm1 = vcmp.eq.s32.totalorder %v28_v8, %v32_v10 }
  0x9a   :  { %v34_v13 = vsel %vm33_vm1, %v16_v5, 0.0 }
  0x9b   :  { %v35_v14 = vsel %vm12_vm0, %v34_v13, 0.0 }
  0x9f   :  { %v51_v9 = vpop.eup %50 }
  0xa0   :  { %v19_v11 = vsel %vm12_vm0, %v51_v9, 0.0 }
  0xa1   :  { %20 = vadd.xlane.f32.xlu1 %v19_v11 }
  0xa5   :  { %25 = vadd.xlane.f32.xlu1 %v24_v12 }
  0xa9   :  { %36 = vadd.xlane.f32.xlu1 %v35_v14 }
 0x12e   :  { %v21_v15 = vpop.xlane.xlu1 %20 }
 0x12f   :  { %52 = vlog2.f32 %v21_v15 }
 0x132   :  { %v26_v16 = vpop.xlane.xlu1 %25 }
 0x133   :  { %v38_v20 = vmul.f32 0.011111111, %v26_v16 }
 0x136   :  { %v37_v18 = vpop.xlane.xlu1 %36 }
 0x137   :  { %v40_v22 = vmul.f32 0.8888889, %v37_v18 }
 0x139   :  { %v53_v17 = vpop.eup %52 }
 0x13a   :  { %v23_v19 = vmul.f32 0.6931472, %v53_v17 }
 0x13c   :  { %v39_v21 = vsub.f32 %v23_v19, %v38_v20 }
 0x13e   :  { %v41_v23 = vsub.f32 %v39_v21, %v40_v22 }
 0x140   :  { %43 = vst.msk [vmem:[%s85_s2] sm:$0xff] %vm42_vm2, %v41_v23 }

</bundles_post_ra>
